<compile_context>
chip_gen: v6e
topology: v6e:2x2x1
jax: 0.10.0
libtpu: 0.0.40
codegen_flags: <defaults>
</compile_context>

<pallas_src>
import jax
import jax.numpy as jnp
from jax.experimental import pallas as pl
from jax.experimental.pallas import tpu as pltpu

# ---- hyperparameters (small, consistent with the module's forward) ----------
N_GENES = 16
N_TECH = 2          # forward() hard-codes reshape([-1, n_genes*2]) => n_tech == 2
N_EXPANSION = 4
SHRINKAGE_FACTOR = 10
MINIMUM_SIZE = 10
FINAL_SIZE = 1
BATCH = 8


def connected_sizes(n_genes, shrinkage_factor, minimum_size, final_size):
    # TODO(synk): ConnectedLayers source was not provided; assumed a shrinking MLP
    # (Linear+ReLU while size//shrinkage_factor > minimum_size, then a final
    # Linear(in, final_size) with no trailing activation). For G=16 this degenerates
    # to a single Linear(16 -> 1).
    sizes = [n_genes]
    while sizes[-1] // shrinkage_factor > minimum_size:
        sizes.append(sizes[-1] // shrinkage_factor)
    sizes.append(final_size)
    return sizes


# --------------------- one-time parameter relayout (init) ---------------------
def pack_params(params, *, n_genes, n_tech, n_expansion):
    """Pack every parameter into one (TG, P) f32 slab (one param vector per lane
    column, feature index r = t*G + g on sublanes). Call ONCE at init."""
    G, T, E = n_genes, n_tech, n_expansion
    TG = T * G

    def col(v):
        v = jnp.asarray(v, jnp.float32).reshape(-1)
        assert v.shape[0] <= TG, "parameter vector longer than T*G"
        return jnp.pad(v, (0, TG - v.shape[0]))

    cols = []
    cols += [col(params["w1"][:, e]) for e in range(E)]     # cols [0, E)
    cols += [col(params["b1"][:, e]) for e in range(E)]     # cols [E, 2E)
    cols += [col(params["w2"][:, e]) for e in range(E)]     # cols [2E, 3E)
    cols.append(col(params["b2"]))                          # col 3E
    cols.append(col(params["wg"].T.reshape(-1)))            # col 3E+1 : wg[g,t] at r=t*G+g
    cols.append(col(params["bg"]))                          # col 3E+2 : rows [0, G)

    conn_shapes = []
    for W, b in params["connected"]:
        ni, no = W.shape
        # scalability cliff: one lane column per output unit assumes ni, no <= T*G
        assert ni <= TG and no <= TG
        cols += [col(W[:, k]) for k in range(no)]           # W^T columns
        cols.append(col(b))                                 # bias[k] at sublane k
        conn_shapes.append((ni, no))

    slab = jnp.stack(cols, axis=1)                          # (TG, P)
    P = slab.shape[1]
    Ppad = ((P + 127) // 128) * 128                         # clean vreg lane multiple
    if Ppad != P:
        slab = jnp.pad(slab, ((0, 0), (0, Ppad - P)))
    return slab, tuple(conn_shapes)


# ------------------------------ Pallas kernel --------------------------------
def make_kernel(G, T, E, conn_shapes):
    TG = T * G

    def kernel(x_ref, p_ref, o_ref):
        # (TB, TG) batch-major input tile -> (TG, TB): batch lane-dense, features
        # on sublanes.  Single XLU transpose per tile; everything after it is
        # full-width VPU / aligned-sublane work.
        xt = jnp.transpose(x_ref[...])                       # (TG, TB)

        # Bellows: per-feature Linear(1->E) + ReLU, then Linear(E->1) + ReLU,
        # expressed as E accumulating FMAs over per-expansion parameter columns.
        acc = None
        for e in range(E):
            w1 = p_ref[:, e:e + 1]                           # (TG, 1)
            b1 = p_ref[:, E + e:E + e + 1]
            w2 = p_ref[:, 2 * E + e:2 * E + e + 1]
            term = jnp.maximum(xt * w1 + b1, 0.0) * w2
            acc = term if acc is None else acc + term
        y = jnp.maximum(acc + p_ref[:, 3 * E:3 * E + 1], 0.0)    # (TG, TB)

        # Gene combine: weighted sum over tech (aligned sublane stride G) + bias + ReLU.
        gz = y * p_ref[:, 3 * E + 1:3 * E + 2]
        z = gz[0:G, :]
        for t in range(1, T):
            z = z + gz[t * G:(t + 1) * G, :]
        z = jnp.maximum(z + p_ref[0:G, 3 * E + 2:3 * E + 3], 0.0)  # (G, TB)

        # Connected head: tiny layers stay on VPU multiply + cross-sublane (XLU)
        # sums; the MXU (and its fill/drain latency) never enters the critical path.
        # TODO(synk): if a genuinely wide layer ever appears (no >> 8), pad K to 128
        # and route it through the MXU instead of this per-output-column loop.
        col = 3 * E + 3
        for li, (ni, no) in enumerate(conn_shapes):
            outs = []
            for k in range(no):
                wk = p_ref[0:ni, col + k:col + k + 1]            # (ni, 1) == W[:, k]
                ok = jnp.sum(z * wk, axis=0, keepdims=True)      # (1, TB)
                outs.append(ok + p_ref[k:k + 1, col + no:col + no + 1])
            zn = outs[0] if no == 1 else jnp.concatenate(outs, axis=0)
            if li < len(conn_shapes) - 1:
                zn = jnp.maximum(zn, 0.0)
            z = zn
            col += no + 1

        o_ref[...] = z.astype(o_ref.dtype)                       # (F, TB), lane-dense

    return kernel


# ------------------------------- tiling ---------------------------------------
def _batch_tiling(B, *, tb_max=2048):
    """Pick (tile_rows, num_tiles).  Small B: a single full block (no padding at
    B=8).  Large B: lane-dense (multiple-of-128) tiles with >= 2 (preferably even)
    grid steps so both v7x TensorCores get work via the parallel grid axis."""
    if B <= 256:
        return ((B + 7) // 8) * 8, 1
    tb = min(tb_max, ((pl.cdiv(B, 2) + 127) // 128) * 128)
    nt = pl.cdiv(B, tb)
    if nt > 1 and nt % 2:                    # prefer an even split across two TCs
        tb = min(tb_max, ((pl.cdiv(B, nt + 1) + 127) // 128) * 128)
        nt = pl.cdiv(B, tb)
    return tb, nt


# ------------------------------- wrapper --------------------------------------
def combined_parallel_model(x, packed_params, conn_shapes, *,
                            n_genes, n_tech, n_expansion, tb_max=2048):
    G, T, E = n_genes, n_tech, n_expansion
    TG = T * G
    F = conn_shapes[-1][1]

    # Matches the torch forward's reshape([-1, n_genes*2]); metadata-only for (B, TG).
    x = x.reshape(-1, TG)
    if x.dtype != jnp.float32:
        x = x.astype(jnp.float32)
    B = x.shape[0]

    TB, nt = _batch_tiling(B, tb_max=tb_max)
    Bp = TB * nt
    if Bp != B:
        # TODO(synk): a masked final store would avoid this pad + trailing slice for
        # ragged batches; B=8 (and any tile-divisible batch) takes the zero-op path.
        x = jnp.pad(x, ((0, Bp - B), (0, 0)))

    kernel = make_kernel(G, T, E, conn_shapes)

    # Double-buffered input + output tiles + resident param slab, with headroom.
    est = 2 * (TB * TG + F * TB) * 4 + 2 * packed_params.size * 4 + (2 << 20)
    cp_kwargs = dict(dimension_semantics=("parallel",))
    if est > (16 << 20):                     # only needed if tb_max is pushed very large
        cp_kwargs["vmem_limit_bytes"] = min(est, 60 * 1024 * 1024)  # v7x ceiling 64 MiB

    out = pl.pallas_call(
        kernel,
        out_shape=jax.ShapeDtypeStruct((F, Bp), jnp.float32),
        grid=(nt,),
        in_specs=[
            pl.BlockSpec((TB, TG), lambda i: (i, 0)),             # raw input, no replication
            pl.BlockSpec(packed_params.shape, lambda i: (0, 0)),  # params: resident block
        ],
        out_specs=pl.BlockSpec((F, TB), lambda i: (0, i)),        # lane-dense output store
        compiler_params=pltpu.CompilerParams(**cp_kwargs),
    )(x, packed_params)

    out = out.T                     # (Bp, F); for F == 1 this is a contiguity-preserving reshape
    return out[:B] if Bp != B else out


# -------------------------- pure-JAX reference --------------------------------
def reference(x, params, *, n_genes, n_tech, n_expansion):
    B = x.shape[0]
    G, T, E = n_genes, n_tech, n_expansion
    xr = x.reshape(B, G * T).T                                        # (GT, B)
    # expand (vmapped Linear(1 -> E)) + ReLU
    h = jnp.maximum(xr[:, :, None] * params["w1"][:, None, :]
                    + params["b1"][:, None, :], 0.0)                  # (GT, B, E)
    # shrink (vmapped Linear(E -> 1)) + ReLU
    y = (h * params["w2"][:, None, :]).sum(-1) + params["b2"][:, None]
    y = jnp.maximum(y, 0.0)                                           # (GT, B)
    yt = y.T.reshape(B, T, G)                                         # (B, T, G)
    # gene layers: sum over tech weighted per (gene, tech)
    g = (yt * params["wg"].T[None, :, :]).sum(1) + params["bg"][None, :]
    g = jnp.maximum(g, 0.0)                                           # (B, G)
    # connected head
    out = g
    for i, (W, b) in enumerate(params["connected"]):
        out = (out[:, :, None] * W[None, :, :]).sum(1) + b[None, :]
        if i < len(params["connected"]) - 1:
            out = jnp.maximum(out, 0.0)
    return out


# --------------------------------- main ---------------------------------------
if __name__ == "__main__":
    G, T, E = N_GENES, N_TECH, N_EXPANSION
    key = jax.random.PRNGKey(0)
    ks = jax.random.split(key, 16)

    sizes = connected_sizes(G, SHRINKAGE_FACTOR, MINIMUM_SIZE, FINAL_SIZE)
    connected = []
    for i in range(len(sizes) - 1):
        Wk, bk = jax.random.split(ks[8 + i])
        connected.append((
            0.1 * jax.random.normal(Wk, (sizes[i], sizes[i + 1]), jnp.float32),
            0.1 * jax.random.normal(bk, (sizes[i + 1],), jnp.float32),
        ))

    params = {
        "w1": jax.random.normal(ks[0], (G * T, E), jnp.float32),
        "b1": jax.random.normal(ks[1], (G * T, E), jnp.float32),
        "w2": jax.random.normal(ks[2], (G * T, E), jnp.float32),
        "b2": jax.random.normal(ks[3], (G * T,), jnp.float32),
        "wg": jax.random.normal(ks[4], (G, T), jnp.float32),
        "bg": jax.random.normal(ks[5], (G,), jnp.float32),
        "connected": connected,
    }

    x = jax.random.normal(ks[6], (BATCH, G * T), jnp.float32)

    # init-time relayout (not on the per-call path)
    packed, conn_shapes = pack_params(params, n_genes=G, n_tech=T, n_expansion=E)
    packed = jax.block_until_ready(packed)

    out = combined_parallel_model(
        x, packed, conn_shapes, n_genes=G, n_tech=T, n_expansion=E)
    out = jax.block_until_ready(out)

    ref = reference(x, params, n_genes=G, n_tech=T, n_expansion=E)
    assert out.shape == (BATCH, FINAL_SIZE), out.shape
    assert jnp.allclose(out, ref, rtol=1e-5, atol=2e-5), (out, ref)

    print("KERNEL_OK")
</pallas_src>

<mosaic_0001>
module attributes {stable_mosaic.version = 11 : i64} {
  func.func @kernel(%arg0: i32, %arg1: memref<8x32xf32, #tpu.memory_space<vmem>>, %arg2: memref<32x128xf32, #tpu.memory_space<vmem>>, %arg3: memref<1x8xf32, #tpu.memory_space<vmem>>) attributes {dimension_semantics = [#tpu.dimension_semantics<parallel>], iteration_bounds = array<i64: 1>, scalar_prefetch = 0 : i64, scratch_operands = 0 : i64, tpu.core_type = #tpu.core_type<tc>, window_params = [{transform_indices = @transform_0, window_bounds = array<i64: 8, 32>}, {pipeline_mode = #tpu.pipeline_mode<synchronous>, transform_indices = @transform_1, window_bounds = array<i64: 32, 128>}, {transform_indices = @transform_2, window_bounds = array<i64: 1, 8>}]} {
    %c0 = arith.constant 0 : index
    %c0_0 = arith.constant 0 : index
    %0 = vector.load %arg1[%c0, %c0_0] : memref<8x32xf32, #tpu.memory_space<vmem>>, vector<8x32xf32>
    %1 = tpu.transpose %0, [1, 0] : vector<8x32xf32> -> vector<32x8xf32>
    %c0_1 = arith.constant 0 : index
    %c0_2 = arith.constant 0 : index
    %2 = vector.load %arg2[%c0_1, %c0_2] : memref<32x128xf32, #tpu.memory_space<vmem>>, vector<32x1xf32>
    %c0_3 = arith.constant 0 : index
    %c4 = arith.constant 4 : index
    %3 = vector.load %arg2[%c0_3, %c4] : memref<32x128xf32, #tpu.memory_space<vmem>>, vector<32x1xf32>
    %c0_4 = arith.constant 0 : index
    %c8 = arith.constant 8 : index
    %4 = vector.load %arg2[%c0_4, %c8] : memref<32x128xf32, #tpu.memory_space<vmem>>, vector<32x1xf32>
    %5 = vector.broadcast %2 : vector<32x1xf32> to vector<32x8xf32>
    %6 = arith.mulf %1, %5 : vector<32x8xf32>
    %7 = vector.broadcast %3 : vector<32x1xf32> to vector<32x8xf32>
    %8 = arith.addf %6, %7 : vector<32x8xf32>
    %cst = arith.constant 0.000000e+00 : f32
    %9 = vector.broadcast %cst : f32 to vector<32x8xf32>
    %10 = arith.maximumf %8, %9 : vector<32x8xf32>
    %11 = vector.broadcast %4 : vector<32x1xf32> to vector<32x8xf32>
    %12 = arith.mulf %10, %11 : vector<32x8xf32>
    %c0_5 = arith.constant 0 : index
    %c1 = arith.constant 1 : index
    %13 = vector.load %arg2[%c0_5, %c1] : memref<32x128xf32, #tpu.memory_space<vmem>>, vector<32x1xf32>
    %c0_6 = arith.constant 0 : index
    %c5 = arith.constant 5 : index
    %14 = vector.load %arg2[%c0_6, %c5] : memref<32x128xf32, #tpu.memory_space<vmem>>, vector<32x1xf32>
    %c0_7 = arith.constant 0 : index
    %c9 = arith.constant 9 : index
    %15 = vector.load %arg2[%c0_7, %c9] : memref<32x128xf32, #tpu.memory_space<vmem>>, vector<32x1xf32>
    %16 = vector.broadcast %13 : vector<32x1xf32> to vector<32x8xf32>
    %17 = arith.mulf %1, %16 : vector<32x8xf32>
    %18 = vector.broadcast %14 : vector<32x1xf32> to vector<32x8xf32>
    %19 = arith.addf %17, %18 : vector<32x8xf32>
    %cst_8 = arith.constant 0.000000e+00 : f32
    %20 = vector.broadcast %cst_8 : f32 to vector<32x8xf32>
    %21 = arith.maximumf %19, %20 : vector<32x8xf32>
    %22 = vector.broadcast %15 : vector<32x1xf32> to vector<32x8xf32>
    %23 = arith.mulf %21, %22 : vector<32x8xf32>
    %24 = arith.addf %12, %23 : vector<32x8xf32>
    %c0_9 = arith.constant 0 : index
    %c2 = arith.constant 2 : index
    %25 = vector.load %arg2[%c0_9, %c2] : memref<32x128xf32, #tpu.memory_space<vmem>>, vector<32x1xf32>
    %c0_10 = arith.constant 0 : index
    %c6 = arith.constant 6 : index
    %26 = vector.load %arg2[%c0_10, %c6] : memref<32x128xf32, #tpu.memory_space<vmem>>, vector<32x1xf32>
    %c0_11 = arith.constant 0 : index
    %c10 = arith.constant 10 : index
    %27 = vector.load %arg2[%c0_11, %c10] : memref<32x128xf32, #tpu.memory_space<vmem>>, vector<32x1xf32>
    %28 = vector.broadcast %25 : vector<32x1xf32> to vector<32x8xf32>
    %29 = arith.mulf %1, %28 : vector<32x8xf32>
    %30 = vector.broadcast %26 : vector<32x1xf32> to vector<32x8xf32>
    %31 = arith.addf %29, %30 : vector<32x8xf32>
    %cst_12 = arith.constant 0.000000e+00 : f32
    %32 = vector.broadcast %cst_12 : f32 to vector<32x8xf32>
    %33 = arith.maximumf %31, %32 : vector<32x8xf32>
    %34 = vector.broadcast %27 : vector<32x1xf32> to vector<32x8xf32>
    %35 = arith.mulf %33, %34 : vector<32x8xf32>
    %36 = arith.addf %24, %35 : vector<32x8xf32>
    %c0_13 = arith.constant 0 : index
    %c3 = arith.constant 3 : index
    %37 = vector.load %arg2[%c0_13, %c3] : memref<32x128xf32, #tpu.memory_space<vmem>>, vector<32x1xf32>
    %c0_14 = arith.constant 0 : index
    %c7 = arith.constant 7 : index
    %38 = vector.load %arg2[%c0_14, %c7] : memref<32x128xf32, #tpu.memory_space<vmem>>, vector<32x1xf32>
    %c0_15 = arith.constant 0 : index
    %c11 = arith.constant 11 : index
    %39 = vector.load %arg2[%c0_15, %c11] : memref<32x128xf32, #tpu.memory_space<vmem>>, vector<32x1xf32>
    %40 = vector.broadcast %37 : vector<32x1xf32> to vector<32x8xf32>
    %41 = arith.mulf %1, %40 : vector<32x8xf32>
    %42 = vector.broadcast %38 : vector<32x1xf32> to vector<32x8xf32>
    %43 = arith.addf %41, %42 : vector<32x8xf32>
    %cst_16 = arith.constant 0.000000e+00 : f32
    %44 = vector.broadcast %cst_16 : f32 to vector<32x8xf32>
    %45 = arith.maximumf %43, %44 : vector<32x8xf32>
    %46 = vector.broadcast %39 : vector<32x1xf32> to vector<32x8xf32>
    %47 = arith.mulf %45, %46 : vector<32x8xf32>
    %48 = arith.addf %36, %47 : vector<32x8xf32>
    %c0_17 = arith.constant 0 : index
    %c12 = arith.constant 12 : index
    %49 = vector.load %arg2[%c0_17, %c12] : memref<32x128xf32, #tpu.memory_space<vmem>>, vector<32x1xf32>
    %50 = vector.broadcast %49 : vector<32x1xf32> to vector<32x8xf32>
    %51 = arith.addf %48, %50 : vector<32x8xf32>
    %cst_18 = arith.constant 0.000000e+00 : f32
    %52 = vector.broadcast %cst_18 : f32 to vector<32x8xf32>
    %53 = arith.maximumf %51, %52 : vector<32x8xf32>
    %c0_19 = arith.constant 0 : index
    %c13 = arith.constant 13 : index
    %54 = vector.load %arg2[%c0_19, %c13] : memref<32x128xf32, #tpu.memory_space<vmem>>, vector<32x1xf32>
    %55 = vector.broadcast %54 : vector<32x1xf32> to vector<32x8xf32>
    %56 = arith.mulf %53, %55 : vector<32x8xf32>
    %57 = vector.extract_strided_slice %56 {offsets = [0, 0], sizes = [16, 8], strides = [1, 1]} : vector<32x8xf32> to vector<16x8xf32>
    %58 = vector.extract_strided_slice %56 {offsets = [16, 0], sizes = [16, 8], strides = [1, 1]} : vector<32x8xf32> to vector<16x8xf32>
    %59 = arith.addf %57, %58 : vector<16x8xf32>
    %c0_20 = arith.constant 0 : index
    %c14 = arith.constant 14 : index
    %60 = vector.load %arg2[%c0_20, %c14] : memref<32x128xf32, #tpu.memory_space<vmem>>, vector<16x1xf32>
    %61 = vector.broadcast %60 : vector<16x1xf32> to vector<16x8xf32>
    %62 = arith.addf %59, %61 : vector<16x8xf32>
    %cst_21 = arith.constant 0.000000e+00 : f32
    %63 = vector.broadcast %cst_21 : f32 to vector<16x8xf32>
    %64 = arith.maximumf %62, %63 : vector<16x8xf32>
    %c0_22 = arith.constant 0 : index
    %c15 = arith.constant 15 : index
    %65 = vector.load %arg2[%c0_22, %c15] : memref<32x128xf32, #tpu.memory_space<vmem>>, vector<16x1xf32>
    %66 = vector.broadcast %65 : vector<16x1xf32> to vector<16x8xf32>
    %67 = arith.mulf %64, %66 : vector<16x8xf32>
    %cst_23 = arith.constant dense<0.000000e+00> : vector<8xf32>
    %68 = vector.multi_reduction <add>, %67, %cst_23 [0] : vector<16x8xf32> to vector<8xf32>
    %69 = vector.shape_cast %68 : vector<8xf32> to vector<1x8xf32>
    %c0_24 = arith.constant 0 : index
    %c16 = arith.constant 16 : index
    %70 = vector.load %arg2[%c0_24, %c16] : memref<32x128xf32, #tpu.memory_space<vmem>>, vector<1x1xf32>
    %71 = vector.broadcast %70 : vector<1x1xf32> to vector<1x8xf32>
    %72 = arith.addf %69, %71 : vector<1x8xf32>
    %c0_25 = arith.constant 0 : index
    %c0_26 = arith.constant 0 : index
    %73 = vector.load %arg3[%c0_25, %c0_26] : memref<1x8xf32, #tpu.memory_space<vmem>>, vector<1x8xf32>
    tpu.vector_store %arg3[%c0_25, %c0_26], %72 {strides = array<i32>} : memref<1x8xf32, #tpu.memory_space<vmem>>, vector<1x8xf32>,
    return
  }
  func.func @transform_0(%arg0: i32) -> (i32, i32) {
    %c0_i32 = arith.constant 0 : i32
    %c0_i32_0 = arith.constant 0 : i32
    return %arg0, %c0_i32 : i32, i32
  }
  func.func @transform_1(%arg0: i32) -> (i32, i32) {
    %c0_i32 = arith.constant 0 : i32
    %c0_i32_0 = arith.constant 0 : i32
    %c0_i32_1 = arith.constant 0 : i32
    return %c0_i32, %c0_i32_0 : i32, i32
  }
  func.func @transform_2(%arg0: i32) -> (i32, i32) {
    %c0_i32 = arith.constant 0 : i32
    %c0_i32_0 = arith.constant 0 : i32
    return %c0_i32, %arg0 : i32, i32
  }
}

</mosaic_0001>

<bundles_post_ra>
// kernel: tpu_custom_call.1
= control target key start
LH: loop header
LB: loop body
LE: loop exit
PB: predicated region body
PF: predicated region fallthrough
CT: control target
= control target key end

     0   :  { %7 = vsyncpa [#allocation3], 0  ;;  %s716_s0 = inlined_call_operand.hbm [shape: f32[8,32], index: 0, kind: input, shape index: {}]   ;;  %s717_s1 = inlined_call_operand.hbm [shape: f32[32,128], index: 1, kind: input, shape index: {}]   ;;  %s718_s2 = inlined_call_operand.hbm [shape: f32[1,8], index: 2, kind: output, shape index: {}]  }
   0x1   :  { %8 = vsyncpa [#allocation6], 0 }
   0x2   :  { %9 = vsyncpa [#allocation4], 0  ;;  %s572_s9 = smov [#allocation2]   ;;  %s573_s11 = smov [#allocation5]  }
   0x3   :  { %s16_s10 = sshll.u32 %s572_s9, 4  ;;  %s25_s12 = sshll.u32 %s573_s11, 4  ;;  %s17_s10 = int_to_ptr.vmem [resolvable:$true] %s16_s10  ;;  %s26_s12 = int_to_ptr.vmem [resolvable:$true] %s25_s12 }
   0x4   :  { %s514_s13 = scalar_lea.vmem %s17_s10, 128  ;;  %p519_p1 = scmp.lt.s32.totalorder %s17_s10, %s17_s10 }
   0x5   :  { %p515_p0 = scmp.ne.s32.totalorder %s17_s10, %s514_s13  ;;  %p520_p2 = scmp.lt.s32.totalorder %s514_s13, %s514_s13 }
   0x7   :  { %p521_p3 = por %p520_p2, %p519_p1 }
   0x9   :  { %p522_p4 = pnand %p521_p3, %p515_p0 }
   0xb   :  { %525 = shalt.err (!%p522_p4)
}
   0xc   :  { %19 = dma.hbm_to_vmem [thread:$0]  %s716_s0, 128, %s17_s10, [#allocation3]  }
   0xd   :  { %s534_s16 = scalar_lea.vmem %s26_s12, 512  ;;  %p539_p6 = scmp.lt.s32.totalorder %s26_s12, %s26_s12 }
   0xe   :  { %p535_p5 = scmp.ne.s32.totalorder %s26_s12, %s534_s16  ;;  %p540_p7 = scmp.lt.s32.totalorder %s534_s16, %s534_s16 }
  0x10   :  { %p541_p8 = por %p540_p7, %p539_p6 }
  0x12   :  { %p542_p9 = pnand %p541_p8, %p535_p5 }
  0x14   :  { %545 = shalt.err (!%p542_p9)
}
  0x15   :  { %s574_s17 = smov 128   ;;  %s575_s18 = smov 8  }
  0x16   :  { %31 = dma.hbm_to_vmem [thread:$0]  %s717_s1, 512, %s26_s12, [#allocation6], %s574_s17, %s574_s17, %s575_s18  }
  0x17   :  { %566 = dma.done.wait [#allocation3], 128  }
  0x18   :  { %567 = vsyncadd [#allocation3], 4294967168 }
  0x19   :  { %568 = dma.done.wait [#allocation6], 512  }
  0x1a   :  { %569 = vsyncadd [#allocation6], 4294966784  ;;  %v576_v0 = vmov 0   ;;  %v615_v1 = vld [vmem:[#allocation5 + $0x8] sm:$0xff]  ;;  %v38_v2 = vld [vmem:[#allocation2] sm:$0xff]  ;;  %v577_v6 = vmov 4  }
  0x1b   :  { %478 = vset.pattern.permute.xlu1 %v576_v0  ;;  %39 = vxpose.xlu0.b32.start.end [1/1] (short) (narrow) %v38_v2, 32  ;;  %v618_v3 = vld [vmem:[#allocation5 + $0x10] sm:$0xff]  ;;  %v621_v4 = vld [vmem:[#allocation5 + $0x18] sm:$0xff]  ;;  %v624_v5 = vld [vmem:[#allocation5] sm:$0xff]  ;;  %v578_v7 = vmov 8   ;;  %v579_v8 = vmov 1  }
  0x1c   :  { %82 = vperm.xlu1 %478, %v615_v1   ;;  %v580_v9 = vmov 5   ;;  %v581_v10 = vmov 9   ;;  %v582_v11 = vmov 2   ;;  %v583_v12 = vmov 6   ;;  %v429_v23 = vld [vmem:[#allocation5] sm:$0x1] }
  0x1d   :  { %v584_v13 = vmov 3   ;;  %v585_v14 = vmov 7   ;;  %v586_v15 = vmov 10   ;;  %v587_v16 = vmov 11   ;;  %s593_s0 = smov [#allocation7]  }
  0x1e   :  { %v588_v17 = vmov 12   ;;  %v589_v18 = vmov 13   ;;  %v590_v22 = vmov 14   ;;  %v591_v26 = vmov 16   ;;  %s444_s1 = sshll.u32 %s593_s0, 4  ;;  %s445_s1 = int_to_ptr.vmem [resolvable:$true] %s444_s1 }
  0x1f   :  { %v592_v53 = vmov 15   ;;  %vm419_vm0 = vcmask 64512   ;;  %vm436_vm1 = vcmask 57344   ;;  %s546_s21 = scalar_lea.vmem %s445_s1, 16  ;;  %s550_s22 = scalar_lea.vmem %s445_s1, 32 }
  0x20   :  { %87 = vperm.xlu1 %478, %v618_v3   ;;  %p547_p10 = scmp.ne.s32.totalorder %s445_s1, %s546_s21  ;;  %p551_p11 = scmp.lt.s32.totalorder %s445_s1, %s445_s1 }
  0x21   :  { %p552_p12 = scmp.lt.s32.totalorder %s550_s22, %s546_s21 }
  0x23   :  { %p553_p13 = por %p552_p12, %p551_p11 }
  0x24   :  { %92 = vperm.xlu1 %478, %v621_v4  }
  0x25   :  { %p554_p0 = pnand %p553_p13, %p547_p10 }
  0x28   :  { %479 = vset.pattern.permute.xlu1 %v577_v6 }
  0x29   :  { %100 = vperm.xlu1 %479, %v624_v5  }
  0x2d   :  { %104 = vperm.xlu1 %479, %v615_v1  }
  0x31   :  { %108 = vperm.xlu1 %479, %v618_v3  }
  0x35   :  { %112 = vperm.xlu1 %479, %v621_v4  }
  0x39   :  { %480 = vset.pattern.permute.xlu1 %v578_v7 }
  0x3a   :  { %124 = vperm.xlu1 %480, %v624_v5  }
  0x3e   :  { %128 = vperm.xlu1 %480, %v615_v1  }
  0x42   :  { %132 = vperm.xlu1 %480, %v618_v3  }
  0x44   :  { %477 = vset.pattern.permute.xlu0 %v576_v0 }
  0x46   :  { %136 = vperm.xlu1 %480, %v621_v4  }
  0x4a   :  { %481 = vset.pattern.permute.xlu1 %v579_v8 }
  0x4b   :  { %144 = vperm.xlu1 %481, %v624_v5  }
  0x4f   :  { %148 = vperm.xlu1 %481, %v615_v1  }
  0x50   :  { %77 = vperm.xlu0 %477, %v624_v5  }
  0x53   :  { %152 = vperm.xlu1 %481, %v618_v3  }
  0x54   :  { %482 = vset.pattern.permute.xlu0 %v580_v9 }
  0x55   :  { %164 = vperm.xlu0 %482, %v624_v5  }
  0x57   :  { %156 = vperm.xlu1 %481, %v621_v4  }
  0x59   :  { %176 = vperm.xlu0 %482, %v621_v4  }
  0x5b   :  { %483 = vset.pattern.permute.xlu1 %v580_v9 }
  0x5c   :  { %168 = vperm.xlu1 %483, %v615_v1  }
  0x5d   :  { %485 = vset.pattern.permute.xlu0 %v581_v10 }
  0x5e   :  { %192 = vperm.xlu0 %485, %v615_v1  }
  0x60   :  { %172 = vperm.xlu1 %483, %v618_v3  }
  0x62   :  { %486 = vset.pattern.permute.xlu0 %v582_v11 }
  0x63   :  { %212 = vperm.xlu0 %486, %v624_v5  }
  0x64   :  { %484 = vset.pattern.permute.xlu1 %v581_v10 }
  0x65   :  { %188 = vperm.xlu1 %484, %v624_v5  }
  0x67   :  { %224 = vperm.xlu0 %486, %v621_v4  }
  0x69   :  { %196 = vperm.xlu1 %484, %v618_v3  }
  0x6b   :  { %489 = vset.pattern.permute.xlu0 %v583_v12 }
  0x6c   :  { %236 = vperm.xlu0 %489, %v615_v1  }
  0x6d   :  { %200 = vperm.xlu1 %484, %v621_v4  }
  0x70   :  { %491 = vset.pattern.permute.xlu0 %v584_v13 }
  0x71   :  { %487 = vset.pattern.permute.xlu1 %v582_v11  ;;  %280 = vperm.xlu0 %491, %v624_v5  }
  0x72   :  { %216 = vperm.xlu1 %487, %v615_v1  }
  0x75   :  { %292 = vperm.xlu0 %491, %v621_v4  }
  0x76   :  { %220 = vperm.xlu1 %487, %v618_v3  }
  0x79   :  { %494 = vset.pattern.permute.xlu0 %v585_v14 }
  0x7a   :  { %488 = vset.pattern.permute.xlu1 %v583_v12  ;;  %304 = vperm.xlu0 %494, %v615_v1  }
  0x7b   :  { %232 = vperm.xlu1 %488, %v624_v5  }
  0x7e   :  { %495 = vset.pattern.permute.xlu0 %v586_v15 }
  0x7f   :  { %240 = vperm.xlu1 %488, %v618_v3   ;;  %256 = vperm.xlu0 %495, %v624_v5  }
  0x83   :  { %244 = vperm.xlu1 %488, %v621_v4   ;;  %268 = vperm.xlu0 %495, %v621_v4  }
  0x87   :  { %490 = vset.pattern.permute.xlu1 %v586_v15  ;;  %497 = vset.pattern.permute.xlu0 %v587_v16 }
  0x88   :  { %260 = vperm.xlu1 %490, %v615_v1   ;;  %332 = vperm.xlu0 %497, %v618_v3  }
  0x8c   :  { %264 = vperm.xlu1 %490, %v618_v3   ;;  %499 = vset.pattern.permute.xlu0 %v588_v17 }
  0x8d   :  { %352 = vperm.xlu0 %499, %v615_v1  }
  0x90   :  { %492 = vset.pattern.permute.xlu1 %v584_v13 }
  0x91   :  { %284 = vperm.xlu1 %492, %v615_v1   ;;  %500 = vset.pattern.permute.xlu0 %v589_v18 }
  0x92   :  { %372 = vperm.xlu0 %500, %v624_v5  }
  0x95   :  { %288 = vperm.xlu1 %492, %v618_v3  }
  0x96   :  { %384 = vperm.xlu0 %500, %v621_v4  }
  0x97   :  { %v83_v19 = vpop.permute.xlu1 %82  ;;  %v668_v20 = vpop.trf.xlu0 }
  0x99   :  { %493 = vset.pattern.permute.xlu1 %v585_v14 }
  0x9a   :  { %300 = vperm.xlu1 %493, %v624_v5   ;;  %503 = vset.pattern.permute.xlu0 %v590_v22 }
  0x9b   :  { %v88_v21 = vpop.permute.xlu1 %87  ;;  %402 = vperm.xlu0 %503, %v615_v1   ;;  %v673_v25 = vpop.trf.xlu0 }
  0x9c   :  { %v96_v29 = vmul.f32 %v83_v19, %v673_v25 }
  0x9e   :  { %308 = vperm.xlu1 %493, %v618_v3  }
  0x9f   :  { %v93_v24 = vpop.permute.xlu1 %92  ;;  %505 = vset.pattern.permute.xlu0 %v591_v26  ;;  %v676_v28 = vpop.trf.xlu0 }
  0xa0   :  { %432 = vperm.xlu0 %505, %v429_v23   ;;  %v97_v32 = vmul.f32 %v88_v21, %v676_v28 }
  0xa2   :  { %312 = vperm.xlu1 %493, %v621_v4  }
  0xa3   :  { %v682_v33 = vpop.trf.xlu0 }
  0xa4   :  { %v101_v27 = vpop.permute.xlu1 %100  ;;  %v98_v36 = vmul.f32 %v93_v24, %v682_v33 }
  0xa6   :  { %496 = vset.pattern.permute.xlu1 %v587_v16 }
  0xa7   :  { %324 = vperm.xlu1 %496, %v624_v5  }
  0xa8   :  { %v105_v30 = vpop.permute.xlu1 %104 }
  0xa9   :  { %v116_v31 = vadd.f32 %v105_v30, %v96_v29 }
  0xab   :  { %328 = vperm.xlu1 %496, %v615_v1   ;;  %v120_v40 = vmax.f32 %v116_v31, 0.0 }
  0xac   :  { %v109_v34 = vpop.permute.xlu1 %108 }
  0xad   :  { %v117_v35 = vadd.f32 %v109_v34, %v97_v32 }
  0xaf   :  { %336 = vperm.xlu1 %496, %v621_v4   ;;  %v121_v43 = vmax.f32 %v117_v35, 0.0 }
  0xb0   :  { %v113_v37 = vpop.permute.xlu1 %112 }
  0xb1   :  { %v118_v38 = vadd.f32 %v113_v37, %v98_v36 }
  0xb3   :  { %498 = vset.pattern.permute.xlu1 %v588_v17  ;;  %v122_v46 = vmax.f32 %v118_v38, 0.0 }
  0xb4   :  { %348 = vperm.xlu1 %498, %v624_v5  }
  0xb5   :  { %v125_v39 = vpop.permute.xlu1 %124 }
  0xb8   :  { %356 = vperm.xlu1 %498, %v618_v3  }
  0xb9   :  { %v129_v41 = vpop.permute.xlu1 %128 }
  0xba   :  { %v140_v42 = vmul.f32 %v129_v41, %v120_v40 }
  0xbc   :  { %360 = vperm.xlu1 %498, %v621_v4  }
  0xbd   :  { %v133_v44 = vpop.permute.xlu1 %132 }
  0xbe   :  { %v141_v45 = vmul.f32 %v133_v44, %v121_v43 }
  0xc0   :  { %501 = vset.pattern.permute.xlu1 %v589_v18 }
  0xc1   :  { %376 = vperm.xlu1 %501, %v615_v1   ;;  %v137_v47 = vpop.permute.xlu1 %136 }
  0xc2   :  { %v142_v48 = vmul.f32 %v137_v47, %v122_v46 }
  0xc5   :  { %380 = vperm.xlu1 %501, %v618_v3  }
  0xc6   :  { %v145_v49 = vpop.permute.xlu1 %144 }
  0xc7   :  { %v159_v0 = vmul.f32 %v145_v49, %v668_v20 }
  0xc9   :  { %502 = vset.pattern.permute.xlu1 %v590_v22 }
  0xca   :  { %397 = vperm.xlu1 %502, %v624_v5   ;;  %v149_v50 = vpop.permute.xlu1 %148 }
  0xcb   :  { %v78_v51 = vpop.permute.xlu0 %77  ;;  %v160_v60 = vmul.f32 %v149_v50, %v673_v25 }
  0xcc   :  { %v95_v52 = vmul.f32 %v78_v51, %v668_v20 }
  0xce   :  { %504 = vset.pattern.permute.xlu1 %v592_v53  ;;  %v153_v54 = vpop.permute.xlu1 %152  ;;  %v115_v55 = vadd.f32 %v101_v27, %v95_v52 }
  0xcf   :  { %410 = vperm.xlu1 %504, %v624_v5   ;;  %v161_v2 = vmul.f32 %v153_v54, %v676_v28 }
  0xd0   :  { %v119_v56 = vmax.f32 %v115_v55, 0.0  ;;  %v165_v57 = vpop.permute.xlu0 %164 }
  0xd1   :  { %v179_v6 = vadd.f32 %v165_v57, %v159_v0 }
  0xd2   :  { %v157_v58 = vpop.permute.xlu1 %156  ;;  %v139_v59 = vmul.f32 %v125_v39, %v119_v56 }
  0xd3   :  { %414 = vperm.xlu1 %504, %v615_v1   ;;  %v183_v10 = vmax.f32 %v179_v6, 0.0  ;;  %v162_v1 = vmul.f32 %v157_v58, %v682_v33 }
  0xd4   :  { %v177_v61 = vpop.permute.xlu0 %176 }
  0xd5   :  { %v182_v13 = vadd.f32 %v177_v61, %v162_v1 }
  0xd7   :  { %v169_v62 = vpop.permute.xlu1 %168  ;;  %v186_v18 = vmax.f32 %v182_v13, 0.0 }
  0xd8   :  { %v180_v63 = vadd.f32 %v169_v62, %v160_v60 }
  0xd9   :  { %v193_v4 = vpop.permute.xlu0 %192 }
  0xda   :  { %v184_v3 = vmax.f32 %v180_v63, 0.0 }
  0xdb   :  { %v173_v7 = vpop.permute.xlu1 %172 }
  0xdc   :  { %v181_v5 = vadd.f32 %v173_v7, %v161_v2  ;;  %v204_v8 = vmul.f32 %v193_v4, %v184_v3 }
  0xde   :  { %v208_v9 = vadd.f32 %v204_v8, %v140_v42  ;;  %v185_v14 = vmax.f32 %v181_v5, 0.0  ;;  %v213_v26 = vpop.permute.xlu0 %212 }
  0xdf   :  { %v227_v51 = vmul.f32 %v213_v26, %v668_v20 }
  0xe0   :  { %v189_v11 = vpop.permute.xlu1 %188 }
  0xe1   :  { %v203_v12 = vmul.f32 %v189_v11, %v183_v10 }
  0xe2   :  { %v225_v30 = vpop.permute.xlu0 %224 }
  0xe3   :  { %v699_v15 = vadd.f32 %v203_v12, %v139_v59  ;;  %v230_v52 = vmul.f32 %v225_v30, %v682_v33 }
  0xe4   :  { %v197_v16 = vpop.permute.xlu1 %196 }
  0xe5   :  { %v205_v17 = vmul.f32 %v197_v16, %v185_v14 }
  0xe7   :  { %v701_v19 = vadd.f32 %v205_v17, %v141_v45  ;;  %v237_v34 = vpop.permute.xlu0 %236 }
  0xe8   :  { %v201_v21 = vpop.permute.xlu1 %200 }
  0xe9   :  { %v206_v22 = vmul.f32 %v201_v21, %v186_v18 }
  0xeb   :  { %v210_v23 = vadd.f32 %v206_v22, %v142_v48 }
  0xec   :  { %v281_v44 = vpop.permute.xlu0 %280 }
  0xed   :  { %v217_v24 = vpop.permute.xlu1 %216  ;;  %v295_v62 = vmul.f32 %v281_v44, %v668_v20 }
  0xee   :  { %v228_v31 = vmul.f32 %v217_v24, %v673_v25 }
  0xf0   :  { %v248_v35 = vadd.f32 %v237_v34, %v228_v31  ;;  %v293_v46 = vpop.permute.xlu0 %292 }
  0xf1   :  { %v221_v27 = vpop.permute.xlu1 %220  ;;  %v298_v60 = vmul.f32 %v293_v46, %v682_v33 }
  0xf2   :  { %v252_v37 = vmax.f32 %v248_v35, 0.0  ;;  %v229_v63 = vmul.f32 %v221_v27, %v676_v28 }
  0xf5   :  { %v305_v49 = vpop.permute.xlu0 %304 }
  0xf6   :  { %v233_v29 = vpop.permute.xlu1 %232 }
  0xf7   :  { %v247_v56 = vadd.f32 %v233_v29, %v227_v51 }
  0xf9   :  { %v251_v2 = vmax.f32 %v247_v56, 0.0 }
  0xfa   :  { %v241_v32 = vpop.permute.xlu1 %240  ;;  %v257_v53 = vpop.permute.xlu0 %256 }
  0xfb   :  { %v249_v6 = vadd.f32 %v241_v32, %v229_v63  ;;  %v271_v12 = vmul.f32 %v257_v53, %v251_v2 }
  0xfd   :  { %v253_v33 = vmax.f32 %v249_v6, 0.0  ;;  %v275_v24 = vadd.f32 %v271_v12, %v699_v15 }
  0xfe   :  { %v245_v36 = vpop.permute.xlu1 %244  ;;  %v269_v58 = vpop.permute.xlu0 %268 }
  0xff   :  { %v250_v57 = vadd.f32 %v245_v36, %v230_v52 }
 0x101   :  { %v254_v3 = vmax.f32 %v250_v57, 0.0 }
 0x103   :  { %v261_v38 = vpop.permute.xlu1 %260  ;;  %v333_v5 = vpop.permute.xlu0 %332  ;;  %v274_v1 = vmul.f32 %v269_v58, %v254_v3 }
 0x104   :  { %v272_v39 = vmul.f32 %v261_v38, %v252_v37 }
 0x105   :  { %v278_v22 = vadd.f32 %v274_v1, %v210_v23 }
 0x106   :  { %v276_v40 = vadd.f32 %v272_v39, %v208_v9 }
 0x107   :  { %v265_v41 = vpop.permute.xlu1 %264 }
 0x108   :  { %v353_v14 = vpop.permute.xlu0 %352  ;;  %v273_v17 = vmul.f32 %v265_v41, %v253_v33 }
 0x10a   :  { %v277_v30 = vadd.f32 %v273_v17, %v701_v19 }
 0x10c   :  { %v285_v42 = vpop.permute.xlu1 %284 }
 0x10d   :  { %v296_v54 = vmul.f32 %v285_v42, %v673_v25  ;;  %v373_v27 = vpop.permute.xlu0 %372 }
 0x10f   :  { %v316_v59 = vadd.f32 %v305_v49, %v296_v54 }
 0x110   :  { %v289_v43 = vpop.permute.xlu1 %288 }
 0x111   :  { %v297_v0 = vmul.f32 %v289_v43, %v676_v28  ;;  %v320_v8 = vmax.f32 %v316_v59, 0.0  ;;  %v385_v38 = vpop.permute.xlu0 %384 }
 0x115   :  { %v301_v45 = vpop.permute.xlu1 %300 }
 0x116   :  { %v315_v7 = vadd.f32 %v301_v45, %v295_v62 }
 0x118   :  { %v319_v13 = vmax.f32 %v315_v7, 0.0 }
 0x119   :  { %v309_v47 = vpop.permute.xlu1 %308 }
 0x11a   :  { %v317_v25 = vadd.f32 %v309_v47, %v297_v0 }
 0x11c   :  { %v321_v20 = vmax.f32 %v317_v25, 0.0 }
 0x11d   :  { %v313_v48 = vpop.permute.xlu1 %312 }
 0x11e   :  { %v318_v4 = vadd.f32 %v313_v48, %v298_v60  ;;  %v341_v26 = vmul.f32 %v333_v5, %v321_v20 }
 0x120   :  { %v322_v11 = vmax.f32 %v318_v4, 0.0  ;;  %v345_v37 = vadd.f32 %v341_v26, %v277_v30 }
 0x122   :  { %v325_v50 = vpop.permute.xlu1 %324 }
 0x123   :  { %v339_v28 = vmul.f32 %v325_v50, %v319_v13  ;;  %v403_v50 = vpop.permute.xlu0 %402 }
 0x125   :  { %v343_v32 = vadd.f32 %v339_v28, %v275_v24 }
 0x126   :  { %v329_v55 = vpop.permute.xlu1 %328 }
 0x127   :  { %v340_v9 = vmul.f32 %v329_v55, %v320_v8  ;;  %v433_v4 = vpop.permute.xlu0 %432 }
 0x129   :  { %v344_v18 = vadd.f32 %v340_v9, %v276_v40 }
 0x12a   :  { %v337_v61 = vpop.permute.xlu1 %336 }
 0x12b   :  { %v342_v16 = vmul.f32 %v337_v61, %v322_v11  ;;  %v364_v31 = vadd.f32 %v353_v14, %v344_v18 }
 0x12d   :  { %v346_v29 = vadd.f32 %v342_v16, %v278_v22  ;;  %v368_v41 = vmax.f32 %v364_v31, 0.0 }
 0x12f   :  { %v349_v10 = vpop.permute.xlu1 %348 }
 0x130   :  { %v363_v36 = vadd.f32 %v349_v10, %v343_v32 }
 0x132   :  { %v367_v23 = vmax.f32 %v363_v36, 0.0 }
 0x133   :  { %v357_v21 = vpop.permute.xlu1 %356 }
 0x134   :  { %v365_v42 = vadd.f32 %v357_v21, %v345_v37  ;;  %v387_v47 = vmul.f32 %v373_v27, %v367_v23 }
 0x136   :  { %v369_v15 = vmax.f32 %v365_v42, 0.0 }
 0x137   :  { %v361_v34 = vpop.permute.xlu1 %360 }
 0x138   :  { %v366_v35 = vadd.f32 %v361_v34, %v346_v29 }
 0x13a   :  { %v370_v39 = vmax.f32 %v366_v35, 0.0 }
 0x13c   :  { %v390_v40 = vmul.f32 %v385_v38, %v370_v39  ;;  %v377_v43 = vpop.permute.xlu1 %376 }
 0x13d   :  { %v388_v44 = vmul.f32 %v377_v43, %v368_v41 }
 0x13f   :  { %v392_v45 = vadd.f32 %v390_v40, %v388_v44 }
 0x140   :  { %v381_v46 = vpop.permute.xlu1 %380 }
 0x141   :  { %v389_v48 = vmul.f32 %v381_v46, %v369_v15  ;;  %v406_v52 = vadd.f32 %v403_v50, %v392_v45 }
 0x143   :  { %v391_v19 = vadd.f32 %v389_v48, %v387_v47  ;;  %v408_v55 = vmax.f32 %v406_v52, 0.0 }
 0x145   :  { %v398_v49 = vpop.permute.xlu1 %397 }
 0x146   :  { %v405_v51 = vadd.f32 %v398_v49, %v391_v19 }
 0x148   :  { %v407_v53 = vmax.f32 %v405_v51, 0.0 }
 0x14a   :  { %v411_v54 = vpop.permute.xlu1 %410 }
 0x14b   :  { %v417_v56 = vmul.f32 %v411_v54, %v407_v53 }
 0x14d   :  { %v420_v59 = vsel %vm419_vm0, %v417_v56, 0.0 }
 0x14e   :  { %v415_v57 = vpop.permute.xlu1 %414 }
 0x14f   :  { %v418_v58 = vmul.f32 %v415_v57, %v408_v55 }
 0x151   :  { %v421_v60 = vsel %vm419_vm0, %v418_v58, 0.0 }
 0x152   :  { %v422_v61 = vadd.f32 %v421_v60, %v420_v59 }
 0x154   :  { %v423_v62 = vrot.slane %v422_v61, 4 }
 0x156   :  { %v424_v63 = vadd.f32 %v423_v62, %v422_v61 }
 0x158   :  { %v425_v0 = vrot.slane %v424_v63, 2 }
 0x15a   :  { %v426_v2 = vadd.f32 %v425_v0, %v424_v63 }
 0x15c   :  { %v427_v3 = vrot.slane %v426_v2, 1 }
 0x15e   :  { %v428_v6 = vadd.f32 %v427_v3, %v426_v2 }
 0x160   :  { %v435_v7 = vadd.f32 %v433_v4, %v428_v6 }
 0x162   :  { %437 = vst.msk [vmem:[#allocation7] sm:$0x1] %vm436_vm1, %v435_v7 }
 0x163   :  { %557 = shalt.err (!%p554_p0)
}
 0x164   :  { %447 = dma.vmem_to_hbm [thread:$0]  %s445_s1, 16, %s718_s2, [#allocation4]  }
 0x165   :  { %570 = dma.done.wait [#allocation4], 16  }
 0x166   :  { %571 = vsyncadd [#allocation4], 4294967280 }
 0x167   :  { %451 = vsyncpa [#allocation3], 1 }
 0x168   :  { %452 = vsyncpa [#allocation6], 1 }
 0x169   :  { %453 = vsyncpa [#allocation4], 1 }

</bundles_post_ra>
